<compile_context>
chip_gen: v5e
topology: v5e:2x2
jax: 0.10.0
libtpu: 0.0.40
codegen_flags: <defaults>
</compile_context>

<pallas_src>
import functools

import jax
import jax.numpy as jnp
from jax import lax
from jax.experimental import pallas as pl
from jax.experimental.pallas import tpu as pltpu

EPS = 1e-5
LANE = 128


# ---------------------------------------------------------------------------
# Kernel 1: one-shot query path  ->  h [B, D]
#
# refs (inputs):
#   e_ref    [B, D]      f32   bn0-applied entity-query rows
#   r_ref    [B, D]      f32   bn0-applied relation rows
#   wexp_ref [10, C*D]   f32   bn1-folded conv weight, expanded: wexp[f, c*D+d] = w[c, f]
#   cb_ref   [1,  C*D]   f32   bn1-folded conv bias,  expanded: cb[0, c*D+d]   = b[c]
#   wf_ref   [C*D, D]    f32   fc.weight^T (bn2 folded when not use_prelu)
#   fb_ref   [1, D]      f32   fc bias (bn2 folded when not use_prelu)
#   [alpha_ref [1, D]    f32   PReLU slope, only if use_prelu]
# refs (outputs):
#   h_ref    [B, D]      f32
# ---------------------------------------------------------------------------
def _query_kernel(e_ref, r_ref, wexp_ref, cb_ref, wf_ref, fb_ref, *rest,
                  use_prelu):
    if use_prelu:
        alpha_ref, h_ref = rest
    else:
        (h_ref,) = rest

    e = e_ref[...]                      # [B, D]
    r = r_ref[...]                      # [B, D]
    B, D = e.shape
    CD = wexp_ref.shape[1]
    C = CD // D

    def shifted(x, s):
        # out[:, d] = x[:, d + s], zero padded -- exactly Conv1d's zero padding.
        if s == 0:
            return x
        if s > 0:
            return jnp.concatenate(
                [x[:, s:], jnp.zeros((B, s), x.dtype)], axis=1)
        return jnp.concatenate(
            [jnp.zeros((B, -s), x.dtype), x[:, :s]], axis=1)

    # im2col taps for Conv1d(2 -> C, kernel=5, padding=2); f = u*5 + k
    # (u: 0 = entity row, 1 = relation row).
    taps = [shifted(src, k - 2) for src in (e, r) for k in range(5)]  # 10 x [B, D]

    wexp = wexp_ref[...]                # [10, C*D]

    # conv_flat[b, c*D+d] = cb[c] + sum_f w[c,f] * taps[f][b,d]   (bn1 folded)
    conv_flat = cb_ref[...] + wexp[0:1, :] * jnp.concatenate([taps[0]] * C, axis=1)
    for f in range(1, 10):
        conv_flat = conv_flat + wexp[f:f + 1, :] * jnp.concatenate(
            [taps[f]] * C, axis=1)
    conv_flat = jnp.maximum(conv_flat, 0.0)          # ReLU; feature_map_drop = id

    # fc as ONE matmul over the flattened [C*D] features (hidden_drop = identity).
    h = jnp.dot(conv_flat, wf_ref[...],
                preferred_element_type=jnp.float32) + fb_ref[...]   # [B, D]

    if use_prelu:
        a = alpha_ref[...]                           # [1, D]
        h = jnp.where(h > 0, h, a * h)
    else:
        h = jnp.maximum(h, 0.0)                      # bn2 folded into fc; ReLU
    h_ref[...] = h


# ---------------------------------------------------------------------------
# Kernel 2: streamed scoring   scores_tile = h @ ent_tile + b_tile
#
# refs (inputs):
#   h_ref   [B, D]        f32   query representations (constant-index / resident)
#   ent_ref [D, E_TILE]   bf16  streamed, lane-dense tile of the transposed table
#   b_ref   [1, E_TILE]   f32   streamed score-bias tile
# refs (outputs):
#   out_ref [B, E_TILE]   f32
# ---------------------------------------------------------------------------
def _score_kernel(h_ref, ent_ref, b_ref, out_ref):
    h = h_ref[...].astype(ent_ref.dtype)             # [B, D] bf16
    sc = jnp.dot(h, ent_ref[...],
                 preferred_element_type=jnp.float32)  # [B, E_TILE] f32 accumulate
    out_ref[...] = sc + b_ref[...]


# ---------------------------------------------------------------------------
# Parameters (deterministic, in-script; PyTorch defaults for BN / PReLU / b).
# ---------------------------------------------------------------------------
def _bn_default(n):
    # (gamma, beta, running_mean, running_var) -- PyTorch eval-mode defaults
    return (jnp.ones((n,), jnp.float32), jnp.zeros((n,), jnp.float32),
            jnp.zeros((n,), jnp.float32), jnp.ones((n,), jnp.float32))


def _bn_affine(bn):
    gamma, beta, mean, var = bn
    scale = gamma * lax.rsqrt(var + EPS)
    return scale, beta - mean * scale


def init_params(key, *, num_entities, num_relations, embedding_dim, channels,
                e_tile=512):
    D, C = embedding_dim, channels
    assert e_tile % LANE == 0
    e_pad = ((num_entities + e_tile - 1) // e_tile) * e_tile
    ks = jax.random.split(key, 6)

    def xavier(k, shape):
        std = (2.0 / (shape[0] + shape[1])) ** 0.5
        return std * jax.random.normal(k, shape, jnp.float32)

    ent = xavier(ks[0], (num_entities, D))
    ent = jnp.pad(ent, ((0, e_pad - num_entities), (0, 0)))

    return {
        # Entity table pre-transposed to [D, E_pad] bf16: E (a lane multiple) lands
        # on the lane axis of the streamed score-matmul operand.
        "ent_emb_t": ent.T.astype(jnp.bfloat16),             # [D, E_pad]
        "rel_emb": xavier(ks[1], (num_relations, D)),         # [R, D] f32
        "conv1_w": 0.1 * jax.random.normal(ks[2], (C, 2, 5), jnp.float32),
        "conv1_b": 0.1 * jax.random.normal(ks[3], (C,), jnp.float32),
        # fc.weight[o, c*D+d] stored transposed as [C*D, D] (== weight.T)
        "fc_w": 0.1 * jax.random.normal(ks[4], (C * D, D), jnp.float32),
        "fc_b": 0.1 * jax.random.normal(ks[5], (D,), jnp.float32),
        "b": jnp.zeros((1, e_pad), jnp.float32),              # score bias (padded)
        "prelu_alpha": jnp.full((D,), 0.25, jnp.float32),      # Bert path only
        "bn0": _bn_default(2),
        "bn1": _bn_default(C),
        "bn2": _bn_default(D),
    }


# ---------------------------------------------------------------------------
# Forward = ConvTransE.forward(queries)  (eval mode).
# ---------------------------------------------------------------------------
def forward(params, queries, *, num_entities, e_tile=512, use_prelu=False):
    ent_t = params["ent_emb_t"]                     # [D, E_pad] bf16
    D, E_pad = ent_t.shape
    B = queries.shape[0]
    C = params["conv1_w"].shape[0]
    assert E_pad % e_tile == 0 and e_tile % LANE == 0

    # ---- tiny embedding gathers + exact bn0 affine (XLA glue) --------------
    e1, rel = queries[:, 0], queries[:, 1]
    e_rows = jnp.take(ent_t, e1, axis=1).T.astype(jnp.float32)   # [B, D]
    r_rows = jnp.take(params["rel_emb"], rel, axis=0)            # [B, D]
    s0, t0 = _bn_affine(params["bn0"])              # per stacked channel (2,)
    e_bn = e_rows * s0[0] + t0[0]                   # bn0 applied BEFORE the conv's
    r_bn = r_rows * s0[1] + t0[1]                   # zero padding (exact, as torch)

    # ---- trace-time folding of bn1 (and bn2) into conv / fc weights --------
    s1, t1 = _bn_affine(params["bn1"])              # per conv channel (C,)
    w_f = params["conv1_w"] * s1[:, None, None]     # [C, 2, 5]
    b_f = params["conv1_b"] * s1 + t1               # [C]
    wc2 = w_f.reshape(C, 10)                        # feature order f = u*5 + k
    w_exp = jnp.repeat(wc2.T, D, axis=1)            # [10, C*D]: w_exp[f, c*D+d]=w[c,f]
    cb_exp = jnp.repeat(b_f, D).reshape(1, C * D)   # [1,  C*D]: cb[0, c*D+d]=b[c]

    wf = params["fc_w"]                             # [C*D, D]
    fb = params["fc_b"]                             # [D]
    if not use_prelu:                               # non-Bert path: bn2 + relu
        s2, t2 = _bn_affine(params["bn2"])
        wf = wf * s2[None, :]
        fb = fb * s2 + t2
    fb = fb.reshape(1, D)

    # ---- kernel 1: one-shot query path -> h [B, D] --------------------------
    q_inputs = [e_bn, r_bn, w_exp, cb_exp, wf, fb]
    if use_prelu:
        q_inputs.append(params["prelu_alpha"].reshape(1, D))
    h = pl.pallas_call(
        functools.partial(_query_kernel, use_prelu=use_prelu),
        out_shape=jax.ShapeDtypeStruct((B, D), jnp.float32),
    )(*q_inputs)

    # ---- kernel 2: stream the transposed entity table, tile by tile ---------
    # Production sizing: grow e_tile to 2048-8192 (keep n_tiles >= 2 and even for
    # v7x's 2 TensorCores); on v7x (64 MiB VMEM) keep 2 buffers * D*e_tile*2B plus
    # resident operands within the scoped limit, or raise vmem_limit_bytes.
    n_tiles = E_pad // e_tile
    scores = pl.pallas_call(
        _score_kernel,
        grid=(n_tiles,),
        in_specs=[
            pl.BlockSpec((B, D), lambda j: (0, 0)),          # h (resident)
            pl.BlockSpec((D, e_tile), lambda j: (0, j)),     # ent_t tile (lane-dense)
            pl.BlockSpec((1, e_tile), lambda j: (0, j)),     # score-bias tile
        ],
        out_specs=pl.BlockSpec((B, e_tile), lambda j: (0, j)),
        out_shape=jax.ShapeDtypeStruct((B, E_pad), jnp.float32),
        compiler_params=pltpu.CompilerParams(
            dimension_semantics=("parallel",)),
    )(h, ent_t, params["b"])

    return scores[:, :num_entities]


if __name__ == "__main__":
    B = 8                 # batched queries (amortizes the entity-table HBM stream)
    D = 32                # args.embedding_dim
    C = 4                 # args.channels
    NUM_ENTITIES = 1000   # padded to 1024 = 2 tiles of E_TILE
    NUM_RELATIONS = 11
    E_TILE = 512          # demo size; production: 2048-8192 (n_tiles >= 2, even)

    key = jax.random.PRNGKey(0)
    kp, kq = jax.random.split(key)
    params = init_params(kp, num_entities=NUM_ENTITIES,
                         num_relations=NUM_RELATIONS,
                         embedding_dim=D, channels=C, e_tile=E_TILE)

    ke, kr = jax.random.split(kq)
    e1 = jax.random.randint(ke, (B,), 0, NUM_ENTITIES)
    rel = jax.random.randint(kr, (B,), 0, NUM_RELATIONS)
    queries = jnp.stack([e1, rel], axis=1).astype(jnp.int32)   # [B, 2]

    fwd = jax.jit(functools.partial(forward, num_entities=NUM_ENTITIES,
                                    e_tile=E_TILE, use_prelu=False))
    scores = jax.block_until_ready(fwd(params, queries))

    assert scores.shape == (B, NUM_ENTITIES), scores.shape
    assert bool(jnp.all(jnp.isfinite(scores)))
    print("KERNEL_OK")
</pallas_src>

<mosaic_0001>
module attributes {stable_mosaic.version = 11 : i64} {
  func.func @_score_kernel(%arg0: i32, %arg1: memref<8x32xf32, #tpu.memory_space<vmem>>, %arg2: memref<32x512xbf16, #tpu.memory_space<vmem>>, %arg3: memref<1x512xf32, #tpu.memory_space<vmem>>, %arg4: memref<8x512xf32, #tpu.memory_space<vmem>>) attributes {dimension_semantics = [#tpu.dimension_semantics<parallel>], iteration_bounds = array<i64: 2>, scalar_prefetch = 0 : i64, scratch_operands = 0 : i64, tpu.core_type = #tpu.core_type<tc>, window_params = [{pipeline_mode = #tpu.pipeline_mode<synchronous>, transform_indices = @transform_0, window_bounds = array<i64: 8, 32>}, {transform_indices = @transform_1, window_bounds = array<i64: 32, 512>}, {transform_indices = @transform_2, window_bounds = array<i64: 1, 512>}, {transform_indices = @transform_3, window_bounds = array<i64: 8, 512>}]} {
    %c0 = arith.constant 0 : index
    %c0_0 = arith.constant 0 : index
    %0 = vector.load %arg1[%c0, %c0_0] : memref<8x32xf32, #tpu.memory_space<vmem>>, vector<8x32xf32>
    %1 = arith.truncf %0 : vector<8x32xf32> to vector<8x32xbf16>
    %c0_1 = arith.constant 0 : index
    %c0_2 = arith.constant 0 : index
    %2 = vector.load %arg2[%c0_1, %c0_2] : memref<32x512xbf16, #tpu.memory_space<vmem>>, vector<32x512xbf16>
    %cst = arith.constant dense<0.000000e+00> : vector<8x512xf32>
    %3 = tpu.matmul %1, %2, %cst {dimension_numbers = #tpu.dot_dimension_numbers<[1], [0], [0], [1], [0, 0, 1, 1], [], []>} : vector<8x32xbf16>, vector<32x512xbf16>, vector<8x512xf32> -> vector<8x512xf32>
    %c0_3 = arith.constant 0 : index
    %c0_4 = arith.constant 0 : index
    %4 = vector.load %arg3[%c0_3, %c0_4] : memref<1x512xf32, #tpu.memory_space<vmem>>, vector<1x512xf32>
    %5 = vector.broadcast %4 : vector<1x512xf32> to vector<8x512xf32>
    %6 = arith.addf %3, %5 : vector<8x512xf32>
    %c0_5 = arith.constant 0 : index
    %c0_6 = arith.constant 0 : index
    %7 = vector.load %arg4[%c0_5, %c0_6] : memref<8x512xf32, #tpu.memory_space<vmem>>, vector<8x512xf32>
    tpu.vector_store %arg4[%c0_5, %c0_6], %6 {strides = array<i32>} : memref<8x512xf32, #tpu.memory_space<vmem>>, vector<8x512xf32>,
    return
  }
  func.func @transform_0(%arg0: i32) -> (i32, i32) {
    %c0_i32 = arith.constant 0 : i32
    %c0_i32_0 = arith.constant 0 : i32
    %c0_i32_1 = arith.constant 0 : i32
    return %c0_i32, %c0_i32_0 : i32, i32
  }
  func.func @transform_1(%arg0: i32) -> (i32, i32) {
    %c0_i32 = arith.constant 0 : i32
    %c0_i32_0 = arith.constant 0 : i32
    return %c0_i32, %arg0 : i32, i32
  }
  func.func @transform_2(%arg0: i32) -> (i32, i32) {
    %c0_i32 = arith.constant 0 : i32
    %c0_i32_0 = arith.constant 0 : i32
    return %c0_i32, %arg0 : i32, i32
  }
  func.func @transform_3(%arg0: i32) -> (i32, i32) {
    %c0_i32 = arith.constant 0 : i32
    %c0_i32_0 = arith.constant 0 : i32
    return %c0_i32, %arg0 : i32, i32
  }
}

module attributes {stable_mosaic.version = 11 : i64} {
  func.func @_query_kernel(%arg0: memref<8x32xf32, #tpu.memory_space<vmem>>, %arg1: memref<8x32xf32, #tpu.memory_space<vmem>>, %arg2: memref<10x128xf32, #tpu.memory_space<vmem>>, %arg3: memref<1x128xf32, #tpu.memory_space<vmem>>, %arg4: memref<128x32xf32, #tpu.memory_space<vmem>>, %arg5: memref<1x32xf32, #tpu.memory_space<vmem>>, %arg6: memref<8x32xf32, #tpu.memory_space<vmem>>) attributes {dimension_semantics = [], scalar_prefetch = 0 : i64, scratch_operands = 0 : i64, tpu.core_type = #tpu.core_type<tc>} {
    %c0 = arith.constant 0 : index
    %c0_0 = arith.constant 0 : index
    %0 = vector.load %arg0[%c0, %c0_0] : memref<8x32xf32, #tpu.memory_space<vmem>>, vector<8x32xf32>
    %c0_1 = arith.constant 0 : index
    %c0_2 = arith.constant 0 : index
    %1 = vector.load %arg1[%c0_1, %c0_2] : memref<8x32xf32, #tpu.memory_space<vmem>>, vector<8x32xf32>
    %cst = arith.constant 0.000000e+00 : f32
    %2 = vector.broadcast %cst : f32 to vector<8x2xf32>
    %3 = vector.extract_strided_slice %0 {offsets = [0, 0], sizes = [8, 30], strides = [1, 1]} : vector<8x32xf32> to vector<8x30xf32>
    %4 = tpu.concatenate %2, %3 in 1 : vector<8x2xf32>, vector<8x30xf32> -> vector<8x32xf32>
    %cst_3 = arith.constant 0.000000e+00 : f32
    %5 = vector.broadcast %cst_3 : f32 to vector<8x1xf32>
    %6 = vector.extract_strided_slice %0 {offsets = [0, 0], sizes = [8, 31], strides = [1, 1]} : vector<8x32xf32> to vector<8x31xf32>
    %7 = tpu.concatenate %5, %6 in 1 : vector<8x1xf32>, vector<8x31xf32> -> vector<8x32xf32>
    %8 = vector.extract_strided_slice %0 {offsets = [0, 1], sizes = [8, 31], strides = [1, 1]} : vector<8x32xf32> to vector<8x31xf32>
    %cst_4 = arith.constant 0.000000e+00 : f32
    %9 = vector.broadcast %cst_4 : f32 to vector<8x1xf32>
    %10 = tpu.concatenate %8, %9 in 1 : vector<8x31xf32>, vector<8x1xf32> -> vector<8x32xf32>
    %11 = vector.extract_strided_slice %0 {offsets = [0, 2], sizes = [8, 30], strides = [1, 1]} : vector<8x32xf32> to vector<8x30xf32>
    %cst_5 = arith.constant 0.000000e+00 : f32
    %12 = vector.broadcast %cst_5 : f32 to vector<8x2xf32>
    %13 = tpu.concatenate %11, %12 in 1 : vector<8x30xf32>, vector<8x2xf32> -> vector<8x32xf32>
    %cst_6 = arith.constant 0.000000e+00 : f32
    %14 = vector.broadcast %cst_6 : f32 to vector<8x2xf32>
    %15 = vector.extract_strided_slice %1 {offsets = [0, 0], sizes = [8, 30], strides = [1, 1]} : vector<8x32xf32> to vector<8x30xf32>
    %16 = tpu.concatenate %14, %15 in 1 : vector<8x2xf32>, vector<8x30xf32> -> vector<8x32xf32>
    %cst_7 = arith.constant 0.000000e+00 : f32
    %17 = vector.broadcast %cst_7 : f32 to vector<8x1xf32>
    %18 = vector.extract_strided_slice %1 {offsets = [0, 0], sizes = [8, 31], strides = [1, 1]} : vector<8x32xf32> to vector<8x31xf32>
    %19 = tpu.concatenate %17, %18 in 1 : vector<8x1xf32>, vector<8x31xf32> -> vector<8x32xf32>
    %20 = vector.extract_strided_slice %1 {offsets = [0, 1], sizes = [8, 31], strides = [1, 1]} : vector<8x32xf32> to vector<8x31xf32>
    %cst_8 = arith.constant 0.000000e+00 : f32
    %21 = vector.broadcast %cst_8 : f32 to vector<8x1xf32>
    %22 = tpu.concatenate %20, %21 in 1 : vector<8x31xf32>, vector<8x1xf32> -> vector<8x32xf32>
    %23 = vector.extract_strided_slice %1 {offsets = [0, 2], sizes = [8, 30], strides = [1, 1]} : vector<8x32xf32> to vector<8x30xf32>
    %cst_9 = arith.constant 0.000000e+00 : f32
    %24 = vector.broadcast %cst_9 : f32 to vector<8x2xf32>
    %25 = tpu.concatenate %23, %24 in 1 : vector<8x30xf32>, vector<8x2xf32> -> vector<8x32xf32>
    %c0_10 = arith.constant 0 : index
    %c0_11 = arith.constant 0 : index
    %26 = vector.load %arg2[%c0_10, %c0_11] : memref<10x128xf32, #tpu.memory_space<vmem>>, vector<10x128xf32>
    %c0_12 = arith.constant 0 : index
    %c0_13 = arith.constant 0 : index
    %27 = vector.load %arg3[%c0_12, %c0_13] : memref<1x128xf32, #tpu.memory_space<vmem>>, vector<1x128xf32>
    %28 = vector.extract_strided_slice %26 {offsets = [0, 0], sizes = [1, 128], strides = [1, 1]} : vector<10x128xf32> to vector<1x128xf32>
    %29 = tpu.concatenate %4, %4, %4, %4 in 1 : vector<8x32xf32>, vector<8x32xf32>, vector<8x32xf32>, vector<8x32xf32> -> vector<8x128xf32>
    %30 = vector.broadcast %28 : vector<1x128xf32> to vector<8x128xf32>
    %31 = arith.mulf %30, %29 : vector<8x128xf32>
    %32 = vector.broadcast %27 : vector<1x128xf32> to vector<8x128xf32>
    %33 = arith.addf %32, %31 : vector<8x128xf32>
    %34 = vector.extract_strided_slice %26 {offsets = [1, 0], sizes = [1, 128], strides = [1, 1]} : vector<10x128xf32> to vector<1x128xf32>
    %35 = tpu.concatenate %7, %7, %7, %7 in 1 : vector<8x32xf32>, vector<8x32xf32>, vector<8x32xf32>, vector<8x32xf32> -> vector<8x128xf32>
    %36 = vector.broadcast %34 : vector<1x128xf32> to vector<8x128xf32>
    %37 = arith.mulf %36, %35 : vector<8x128xf32>
    %38 = arith.addf %33, %37 : vector<8x128xf32>
    %39 = vector.extract_strided_slice %26 {offsets = [2, 0], sizes = [1, 128], strides = [1, 1]} : vector<10x128xf32> to vector<1x128xf32>
    %40 = tpu.concatenate %0, %0, %0, %0 in 1 : vector<8x32xf32>, vector<8x32xf32>, vector<8x32xf32>, vector<8x32xf32> -> vector<8x128xf32>
    %41 = vector.broadcast %39 : vector<1x128xf32> to vector<8x128xf32>
    %42 = arith.mulf %41, %40 : vector<8x128xf32>
    %43 = arith.addf %38, %42 : vector<8x128xf32>
    %44 = vector.extract_strided_slice %26 {offsets = [3, 0], sizes = [1, 128], strides = [1, 1]} : vector<10x128xf32> to vector<1x128xf32>
    %45 = tpu.concatenate %10, %10, %10, %10 in 1 : vector<8x32xf32>, vector<8x32xf32>, vector<8x32xf32>, vector<8x32xf32> -> vector<8x128xf32>
    %46 = vector.broadcast %44 : vector<1x128xf32> to vector<8x128xf32>
    %47 = arith.mulf %46, %45 : vector<8x128xf32>
    %48 = arith.addf %43, %47 : vector<8x128xf32>
    %49 = vector.extract_strided_slice %26 {offsets = [4, 0], sizes = [1, 128], strides = [1, 1]} : vector<10x128xf32> to vector<1x128xf32>
    %50 = tpu.concatenate %13, %13, %13, %13 in 1 : vector<8x32xf32>, vector<8x32xf32>, vector<8x32xf32>, vector<8x32xf32> -> vector<8x128xf32>
    %51 = vector.broadcast %49 : vector<1x128xf32> to vector<8x128xf32>
    %52 = arith.mulf %51, %50 : vector<8x128xf32>
    %53 = arith.addf %48, %52 : vector<8x128xf32>
    %54 = vector.extract_strided_slice %26 {offsets = [5, 0], sizes = [1, 128], strides = [1, 1]} : vector<10x128xf32> to vector<1x128xf32>
    %55 = tpu.concatenate %16, %16, %16, %16 in 1 : vector<8x32xf32>, vector<8x32xf32>, vector<8x32xf32>, vector<8x32xf32> -> vector<8x128xf32>
    %56 = vector.broadcast %54 : vector<1x128xf32> to vector<8x128xf32>
    %57 = arith.mulf %56, %55 : vector<8x128xf32>
    %58 = arith.addf %53, %57 : vector<8x128xf32>
    %59 = vector.extract_strided_slice %26 {offsets = [6, 0], sizes = [1, 128], strides = [1, 1]} : vector<10x128xf32> to vector<1x128xf32>
    %60 = tpu.concatenate %19, %19, %19, %19 in 1 : vector<8x32xf32>, vector<8x32xf32>, vector<8x32xf32>, vector<8x32xf32> -> vector<8x128xf32>
    %61 = vector.broadcast %59 : vector<1x128xf32> to vector<8x128xf32>
    %62 = arith.mulf %61, %60 : vector<8x128xf32>
    %63 = arith.addf %58, %62 : vector<8x128xf32>
    %64 = vector.extract_strided_slice %26 {offsets = [7, 0], sizes = [1, 128], strides = [1, 1]} : vector<10x128xf32> to vector<1x128xf32>
    %65 = tpu.concatenate %1, %1, %1, %1 in 1 : vector<8x32xf32>, vector<8x32xf32>, vector<8x32xf32>, vector<8x32xf32> -> vector<8x128xf32>
    %66 = vector.broadcast %64 : vector<1x128xf32> to vector<8x128xf32>
    %67 = arith.mulf %66, %65 : vector<8x128xf32>
    %68 = arith.addf %63, %67 : vector<8x128xf32>
    %69 = vector.extract_strided_slice %26 {offsets = [8, 0], sizes = [1, 128], strides = [1, 1]} : vector<10x128xf32> to vector<1x128xf32>
    %70 = tpu.concatenate %22, %22, %22, %22 in 1 : vector<8x32xf32>, vector<8x32xf32>, vector<8x32xf32>, vector<8x32xf32> -> vector<8x128xf32>
    %71 = vector.broadcast %69 : vector<1x128xf32> to vector<8x128xf32>
    %72 = arith.mulf %71, %70 : vector<8x128xf32>
    %73 = arith.addf %68, %72 : vector<8x128xf32>
    %74 = vector.extract_strided_slice %26 {offsets = [9, 0], sizes = [1, 128], strides = [1, 1]} : vector<10x128xf32> to vector<1x128xf32>
    %75 = tpu.concatenate %25, %25, %25, %25 in 1 : vector<8x32xf32>, vector<8x32xf32>, vector<8x32xf32>, vector<8x32xf32> -> vector<8x128xf32>
    %76 = vector.broadcast %74 : vector<1x128xf32> to vector<8x128xf32>
    %77 = arith.mulf %76, %75 : vector<8x128xf32>
    %78 = arith.addf %73, %77 : vector<8x128xf32>
    %cst_14 = arith.constant 0.000000e+00 : f32
    %79 = vector.broadcast %cst_14 : f32 to vector<8x128xf32>
    %80 = arith.maximumf %78, %79 : vector<8x128xf32>
    %c0_15 = arith.constant 0 : index
    %c0_16 = arith.constant 0 : index
    %81 = vector.load %arg4[%c0_15, %c0_16] : memref<128x32xf32, #tpu.memory_space<vmem>>, vector<128x32xf32>
    %cst_17 = arith.constant dense<0.000000e+00> : vector<8x32xf32>
    %82 = tpu.matmul %80, %81, %cst_17 {dimension_numbers = #tpu.dot_dimension_numbers<[1], [0], [0], [1], [0, 0, 1, 1], [], []>} : vector<8x128xf32>, vector<128x32xf32>, vector<8x32xf32> -> vector<8x32xf32>
    %c0_18 = arith.constant 0 : index
    %c0_19 = arith.constant 0 : index
    %83 = vector.load %arg5[%c0_18, %c0_19] : memref<1x32xf32, #tpu.memory_space<vmem>>, vector<1x32xf32>
    %84 = vector.broadcast %83 : vector<1x32xf32> to vector<8x32xf32>
    %85 = arith.addf %82, %84 : vector<8x32xf32>
    %cst_20 = arith.constant 0.000000e+00 : f32
    %86 = vector.broadcast %cst_20 : f32 to vector<8x32xf32>
    %87 = arith.maximumf %85, %86 : vector<8x32xf32>
    %c0_21 = arith.constant 0 : index
    %c0_22 = arith.constant 0 : index
    %88 = vector.load %arg6[%c0_21, %c0_22] : memref<8x32xf32, #tpu.memory_space<vmem>>, vector<8x32xf32>
    tpu.vector_store %arg6[%c0_21, %c0_22], %87 {strides = array<i32>} : memref<8x32xf32, #tpu.memory_space<vmem>>, vector<8x32xf32>,
    return
  }
}

</mosaic_0001>

<bundles_post_ra>
// kernel: forward.2
= control target key start
LH: loop header
LB: loop body
LE: loop exit
PB: predicated region body
PF: predicated region fallthrough
CT: control target
= control target key end

     0   :  { %s286_s23 = smov 2   ;;  %s287_s24 = smov 127   ;;  %vm29_vm0 = vcmask 15360   ;;  %vm34_vm1 = vcmask 7168   ;;  %vm39_vm2 = vcmask 252928   ;;  %vm44_vm3 = vcmask 244736   ;;  %s562_s0 = inlined_call_operand.vmem [shape: f32[8,32], index: 0, kind: input, shape index: {}]   ;;  %s563_s1 = inlined_call_operand.vmem [shape: f32[8,32], index: 1, kind: input, shape index: {}]   ;;  %s564_s3 = inlined_call_operand.vmem [shape: f32[1,128], index: 3, kind: input, shape index: {}]   ;;  %s565_s5 = inlined_call_operand.vmem [shape: f32[1,32], index: 5, kind: input, shape index: {}]   ;;  %s566_s4 = inlined_call_operand.vmem [shape: f32[128,32], index: 4, kind: input, shape index: {}]   ;;  %s567_s2 = inlined_call_operand.vmem [shape: f32[10,128], index: 2, kind: input, shape index: {}]   ;;  %s568_s6 = inlined_call_operand.vmem [shape: f32[8,32], index: 6, kind: output, shape index: {}]  }
   0x1   :  { %v331_v0 = vld [vmem:[%s562_s0] sm:$0xff]  ;;  %s288_s27 = smov 1   ;;  %s289_s28 = smov 126   ;;  %v246_v28 = vld [vmem:[%s566_s4 + $0x78] sm:$0xff]  ;;  %v245_v30 = vld [vmem:[%s566_s4 + $0x70] sm:$0xff]  ;;  %vm76_vm4 = vcmask 261120  }
   0x2   :  { %26 = vrot.lane.b32.xlu0 %v331_v0, %s286_s23  ;;  %36 = vrot.lane.b32.xlu1 %v331_v0, %s287_s24  ;;  %v338_v1 = vld [vmem:[%s563_s1] sm:$0xff]  ;;  %s290_s0 = smov 32   ;;  %s291_s1 = smov 96   ;;  %v244_v31 = vld [vmem:[%s566_s4 + $0x68] sm:$0xff]  ;;  %vm78_vm5 = vcmask 523264   ;;  %vm80_vm6 = vcmask 785408  }
   0x3   :  { %47 = vrot.lane.b32.xlu2 %v338_v1, %s286_s23  ;;  %s292_s29 = smov 64   ;;  %251 = vmatpush.msra.mxu0 %v246_v28  ;;  %v243_v32 = vld [vmem:[%s566_s4 + $0x60] sm:$0xff]  ;;  %v242_v35 = vld [vmem:[%s566_s4 + $0x58] sm:$0xff]  ;;  %v241_v36 = vld [vmem:[%s566_s4 + $0x50] sm:$0xff] }
   0x4   :  { %v240_v38 = vld [vmem:[%s566_s4 + $0x48] sm:$0xff]  ;;  %v239_v39 = vld [vmem:[%s566_s4 + $0x40] sm:$0xff]  ;;  %v238_v42 = vld [vmem:[%s566_s4 + $0x38] sm:$0xff] }
   0x5   :  { %252 = vmatpush.msra.mxu0 %v245_v30  ;;  %v237_v43 = vld [vmem:[%s566_s4 + $0x30] sm:$0xff]  ;;  %v236_v44 = vld [vmem:[%s566_s4 + $0x28] sm:$0xff]  ;;  %v235_v45 = vld [vmem:[%s566_s4 + $0x20] sm:$0xff] }
   0x6   :  { %v234_v49 = vld [vmem:[%s566_s4 + $0x18] sm:$0xff]  ;;  %v233_v50 = vld [vmem:[%s566_s4 + $0x10] sm:$0xff]  ;;  %v232_v52 = vld [vmem:[%s566_s4 + $0x8] sm:$0xff] }
   0x7   :  { %253 = vmatpush.msra.mxu0 %v244_v31  ;;  %v495_v55 = vld [vmem:[%s567_s2] sm:$0xff] }
   0x8   :  { %v231_v56 = vld [vmem:[%s566_s4] sm:$0xff]  ;;  %v82_v57 = vperm.slane %v495_v55, 0  ;;  %v101_v62 = vperm.slane %v495_v55, 1 }
   0x9   :  { %254 = vmatpush.msra.mxu0 %v243_v32 }
   0xa   :  { %31 = vrot.lane.b32.xlu0 %v331_v0, %s288_s27  ;;  %41 = vrot.lane.b32.xlu1 %v331_v0, %s289_s28 }
   0xb   :  { %51 = vrot.lane.b32.xlu2 %v338_v1, %s288_s27  ;;  %255 = vmatpush.msra.mxu0 %v242_v35 }
   0xd   :  { %256 = vmatpush.msra.mxu0 %v241_v36 }
   0xf   :  { %257 = vmatpush.msra.mxu0 %v240_v38  ;;  %v180_v38 = vperm.slane %v495_v55, 6 }
  0x11   :  { %258 = vmatpush.msra.mxu0 %v239_v39 }
  0x12   :  { %55 = vrot.lane.b32.xlu0 %v338_v1, %s287_s24  ;;  %59 = vrot.lane.b32.xlu1 %v338_v1, %s289_s28 }
  0x13   :  { %104 = vrot.lane.b32.xlu2 %v331_v0, %s290_s0  ;;  %259 = vmatpush.msra.mxu0 %v238_v42 }
  0x15   :  { %260 = vmatpush.msra.mxu0 %v237_v43 }
  0x17   :  { %261 = vmatpush.msra.mxu0 %v236_v44  ;;  %v64_v44 = vld [vmem:[%s567_s2 + $0x8] sm:$0x3] }
  0x19   :  { %262 = vmatpush.msra.mxu0 %v235_v45 }
  0x1a   :  { %110 = vrot.lane.b32.xlu1 %v331_v0, %s291_s1  ;;  %107 = vrot.lane.b32.xlu0 %v331_v0, %s292_s29 }
  0x1b   :  { %183 = vrot.lane.b32.xlu2 %v338_v1, %s290_s0  ;;  %263 = vmatpush.msra.mxu0 %v234_v49 }
  0x1d   :  { %264 = vmatpush.msra.mxu0 %v233_v50  ;;  %v211_v50 = vperm.slane %v64_v44, 0 }
  0x1f   :  { %265 = vmatpush.msra.mxu0 %v232_v52 }
  0x21   :  { %266 = vmatpush.msra.mxu0 %v231_v56 }
  0x22   :  { %189 = vrot.lane.b32.xlu1 %v338_v1, %s291_s1  ;;  %186 = vrot.lane.b32.xlu0 %v338_v1, %s292_s29 }
  0x5d   :  { %v48_v10 = vpop.permute.xlu2 %47 }
  0x5e   :  { %v395_v11 = vsel %vm29_vm0, 0.0, %v48_v10 }
  0x65   :  { %v52_v12 = vpop.permute.xlu2 %51 }
  0x66   :  { %v404_v13 = vsel %vm34_vm1, 0.0, %v52_v12 }
  0x6d   :  { %v430_v18 = vpop.permute.xlu2 %104 }
  0x74   :  { %v27_v2 = vpop.permute.xlu0 %26  ;;  %v37_v6 = vpop.permute.xlu1 %36 }
  0x75   :  { %v359_v3 = vsel %vm29_vm0, 0.0, %v27_v2  ;;  %v377_v7 = vsel %vm39_vm2, %v37_v6, 0.0  ;;  %v432_v19 = vpop.permute.xlu2 %183  ;;  %v113_v2 = vsel %vm76_vm4, %v331_v0, %v430_v18  ;;  %v116_v0 = vperm.slane %v495_v55, 2 }
  0x76   :  { %73 = vrot.lane.b32.xlu1 %v359_v3, %s291_s1  ;;  %70 = vrot.lane.b32.xlu0 %v359_v3, %s292_s29  ;;  %v132_v18 = vperm.slane %v495_v55, 3  ;;  %v192_v39 = vsel %vm76_vm4, %v338_v1, %v432_v19  ;;  %v195_v19 = vperm.slane %v495_v55, 7 }
  0x77   :  { %67 = vrot.lane.b32.xlu2 %v359_v3, %s290_s0 }
  0x7c   :  { %v32_v4 = vpop.permute.xlu0 %31  ;;  %v42_v8 = vpop.permute.xlu1 %41 }
  0x7d   :  { %v368_v5 = vsel %vm34_vm1, 0.0, %v32_v4  ;;  %v386_v9 = vsel %vm44_vm3, %v42_v8, 0.0  ;;  %v284_v4 = vld [vmem:[%s564_s3] ss:$0 sm:$0xff] }
  0x7e   :  { %95 = vrot.lane.b32.xlu1 %v368_v5, %s291_s1  ;;  %92 = vrot.lane.b32.xlu0 %v368_v5, %s292_s29 }
  0x7f   :  { %89 = vrot.lane.b32.xlu2 %v368_v5, %s290_s0 }
  0x84   :  { %v56_v14 = vpop.permute.xlu0 %55  ;;  %v60_v16 = vpop.permute.xlu1 %59 }
  0x85   :  { %v413_v15 = vsel %vm39_vm2, %v56_v14, 0.0  ;;  %v422_v17 = vsel %vm44_vm3, %v60_v16, 0.0 }
  0x86   :  { %126 = vrot.lane.b32.xlu1 %v377_v7, %s291_s1  ;;  %123 = vrot.lane.b32.xlu0 %v377_v7, %s292_s29 }
  0x87   :  { %120 = vrot.lane.b32.xlu2 %v377_v7, %s290_s0 }
  0x8c   :  { %v434_v20 = vpop.permute.xlu1 %110  ;;  %v436_v21 = vpop.permute.xlu0 %107 }
  0x8d   :  { %v114_v8 = vsel %vm78_vm5, %v113_v2, %v436_v21 }
  0x8e   :  { %142 = vrot.lane.b32.xlu1 %v386_v9, %s291_s1  ;;  %139 = vrot.lane.b32.xlu0 %v386_v9, %s292_s29 }
  0x8f   :  { %136 = vrot.lane.b32.xlu2 %v386_v9, %s290_s0 }
  0x94   :  { %v438_v23 = vpop.permute.xlu1 %189  ;;  %v440_v24 = vpop.permute.xlu0 %186 }
  0x96   :  { %158 = vrot.lane.b32.xlu1 %v395_v11, %s291_s1  ;;  %155 = vrot.lane.b32.xlu0 %v395_v11, %s292_s29 }
  0x97   :  { %152 = vrot.lane.b32.xlu2 %v395_v11, %s290_s0 }
  0x9e   :  { %174 = vrot.lane.b32.xlu1 %v404_v13, %s291_s1  ;;  %171 = vrot.lane.b32.xlu0 %v404_v13, %s292_s29 }
  0x9f   :  { %168 = vrot.lane.b32.xlu2 %v404_v13, %s290_s0 }
  0xa6   :  { %205 = vrot.lane.b32.xlu1 %v413_v15, %s291_s1  ;;  %202 = vrot.lane.b32.xlu0 %v413_v15, %s292_s29 }
  0xa7   :  { %199 = vrot.lane.b32.xlu2 %v413_v15, %s290_s0 }
  0xae   :  { %221 = vrot.lane.b32.xlu1 %v422_v17, %s291_s1  ;;  %218 = vrot.lane.b32.xlu0 %v422_v17, %s292_s29 }
  0xaf   :  { %215 = vrot.lane.b32.xlu2 %v422_v17, %s290_s0 }
  0xd1   :  { %v68_v22 = vpop.permute.xlu2 %67 }
  0xd2   :  { %v77_v51 = vsel %vm76_vm4, %v359_v3, %v68_v22 }
  0xd9   :  { %v90_v25 = vpop.permute.xlu2 %89 }
  0xda   :  { %v98_v54 = vsel %vm76_vm4, %v368_v5, %v90_v25  ;;  %v115_v25 = vsel %vm80_vm6, %v114_v8, %v434_v20 }
  0xdb   :  { %v117_v32 = vmul.f32 %v116_v0, %v115_v25 }
  0xe1   :  { %v121_v29 = vpop.permute.xlu2 %120 }
  0xe2   :  { %v129_v6 = vsel %vm76_vm4, %v377_v7, %v121_v29 }
  0xe8   :  { %v74_v26 = vpop.permute.xlu1 %73  ;;  %v71_v27 = vpop.permute.xlu0 %70 }
  0xe9   :  { %v137_v37 = vpop.permute.xlu2 %136  ;;  %v79_v53 = vsel %vm78_vm5, %v77_v51, %v71_v27 }
  0xea   :  { %v81_v59 = vsel %vm80_vm6, %v79_v53, %v74_v26  ;;  %v145_v14 = vsel %vm76_vm4, %v386_v9, %v137_v37  ;;  %v148_v9 = vperm.slane %v495_v55, 4 }
  0xeb   :  { %v83_v5 = vmul.f32 %v82_v57, %v81_v59  ;;  %v227_v57 = vperm.slane %v64_v44, 1 }
  0xed   :  { %v87_v16 = vadd.f32 %v284_v4, %v83_v5 }
  0xf0   :  { %v96_v33 = vpop.permute.xlu1 %95  ;;  %v93_v34 = vpop.permute.xlu0 %92 }
  0xf1   :  { %v153_v46 = vpop.permute.xlu2 %152  ;;  %v99_v58 = vsel %vm78_vm5, %v98_v54, %v93_v34  ;;  %v164_v34 = vperm.slane %v495_v55, 5 }
  0xf2   :  { %v100_v3 = vsel %vm80_vm6, %v99_v58, %v96_v33  ;;  %v161_v7 = vsel %vm76_vm4, %v395_v11, %v153_v46  ;;  %v193_v46 = vsel %vm78_vm5, %v192_v39, %v440_v24 }
  0xf3   :  { %v102_v10 = vmul.f32 %v101_v62, %v100_v3  ;;  %v285_v3 = vld [vmem:[%s565_s5] ss:$0 sm:$0xff] }
  0xf5   :  { %v103_v28 = vadd.f32 %v102_v10, %v87_v16 }
  0xf7   :  { %v118_v36 = vadd.f32 %v117_v32, %v103_v28 }
  0xf8   :  { %v127_v40 = vpop.permute.xlu1 %126  ;;  %v124_v41 = vpop.permute.xlu0 %123 }
  0xf9   :  { %v169_v63 = vpop.permute.xlu2 %168  ;;  %v130_v12 = vsel %vm78_vm5, %v129_v6, %v124_v41 }
  0xfa   :  { %v131_v21 = vsel %vm80_vm6, %v130_v12, %v127_v40  ;;  %v177_v30 = vsel %vm76_vm4, %v404_v13, %v169_v63 }
  0xfb   :  { %v133_v33 = vmul.f32 %v132_v18, %v131_v21 }
  0xfd   :  { %v134_v40 = vadd.f32 %v133_v33, %v118_v36 }
 0x100   :  { %v143_v47 = vpop.permute.xlu1 %142  ;;  %v140_v48 = vpop.permute.xlu0 %139 }
 0x101   :  { %v146_v22 = vsel %vm78_vm5, %v145_v14, %v140_v48  ;;  %v200_v20 = vpop.permute.xlu2 %199 }
 0x102   :  { %v147_v31 = vsel %vm80_vm6, %v146_v22, %v143_v47  ;;  %v208_v42 = vsel %vm76_vm4, %v413_v15, %v200_v20  ;;  %v194_v15 = vsel %vm80_vm6, %v193_v46, %v438_v23 }
 0x103   :  { %v149_v37 = vmul.f32 %v148_v9, %v147_v31  ;;  %v196_v54 = vmul.f32 %v195_v19, %v194_v15 }
 0x105   :  { %v150_v47 = vadd.f32 %v149_v37, %v134_v40 }
 0x108   :  { %v159_v60 = vpop.permute.xlu1 %158  ;;  %v156_v61 = vpop.permute.xlu0 %155 }
 0x109   :  { %v162_v29 = vsel %vm78_vm5, %v161_v7, %v156_v61  ;;  %v216_v52 = vpop.permute.xlu2 %215 }
 0x10a   :  { %v163_v35 = vsel %vm80_vm6, %v162_v29, %v159_v60  ;;  %v224_v24 = vsel %vm76_vm4, %v422_v17, %v216_v52 }
 0x10b   :  { %v165_v41 = vmul.f32 %v164_v34, %v163_v35 }
 0x10d   :  { %v166_v49 = vadd.f32 %v165_v41, %v150_v47 }
 0x110   :  { %v175_v26 = vpop.permute.xlu1 %174  ;;  %v172_v27 = vpop.permute.xlu0 %171 }
 0x111   :  { %v178_v11 = vsel %vm78_vm5, %v177_v30, %v172_v27 }
 0x112   :  { %v179_v13 = vsel %vm80_vm6, %v178_v11, %v175_v26 }
 0x113   :  { %v181_v48 = vmul.f32 %v180_v38, %v179_v13 }
 0x115   :  { %v182_v53 = vadd.f32 %v181_v48, %v166_v49 }
 0x117   :  { %v197_v55 = vadd.f32 %v196_v54, %v182_v53 }
 0x118   :  { %v206_v43 = vpop.permute.xlu1 %205  ;;  %v203_v45 = vpop.permute.xlu0 %202 }
 0x119   :  { %v209_v1 = vsel %vm78_vm5, %v208_v42, %v203_v45 }
 0x11a   :  { %v210_v51 = vsel %vm80_vm6, %v209_v1, %v206_v43 }
 0x11b   :  { %v212_v56 = vmul.f32 %v211_v50, %v210_v51 }
 0x11d   :  { %v213_v62 = vadd.f32 %v212_v56, %v197_v55 }
 0x120   :  { %v222_v58 = vpop.permute.xlu1 %221  ;;  %v219_v59 = vpop.permute.xlu0 %218 }
 0x121   :  { %v225_v60 = vsel %vm78_vm5, %v224_v24, %v219_v59 }
 0x122   :  { %v226_v61 = vsel %vm80_vm6, %v225_v60, %v222_v58 }
 0x123   :  { %v228_v63 = vmul.f32 %v227_v57, %v226_v61 }
 0x125   :  { %v229_v23 = vadd.f32 %v228_v63, %v213_v62 }
 0x127   :  { %v230_v2 = vmax.f32 %v229_v23, 0.0 }
 0x129   :  { %267 = vmatmul.f32.vlgmr.msra.gmra.mxu0 %v230_v2 }
 0x1a6   :  { %v268_v4 = vpop.f32.mrf.mxu0 }
 0x1a7   :  { %v269_v5 = vadd.f32 %v285_v3, %v268_v4 }
 0x1a9   :  { %v271_v6 = vmax.f32 %v269_v5, 0.0 }
 0x1ab   :  { %272 = vst.msk [vmem:[%s568_s6] sm:$0xff] %vm76_vm4, %v271_v6 }

// kernel: forward.3
= control target key start
LH: loop header
LB: loop body
LE: loop exit
PB: predicated region body
PF: predicated region fallthrough
CT: control target
= control target key end

     0   :  { %8 = vsyncpa [#allocation4], 0  ;;  %s722_s0 = inlined_call_operand.vmem [shape: f32[8,32], index: 0, kind: input, shape index: {}]   ;;  %s723_s1 = inlined_call_operand.vmem [shape: bf16[32,1024], index: 1, kind: input, shape index: {}]   ;;  %s724_s2 = inlined_call_operand.vmem [shape: f32[1,1024], index: 2, kind: input, shape index: {}]   ;;  %s725_s3 = inlined_call_operand.hbm [shape: f32[8,1024], index: 3, kind: output, shape index: {}]  }
   0x1   :  { %10 = vsyncpa [#allocation4 + $0x1], 0  ;;  %s620_s12 = smov 0   ;;  %s622_s13 = smov 0  }
   0x2   :  { %s624_s14 = smov 0   ;;  %s626_s15 = smov 0  }
   0x3 LB: > { %s641_s16 = sadd.s32 4294967295, %s598_s15   ;;  %s436_s17 = sadd.s32 4294967294, %s598_s15   ;;  %s598_s15 = sphi %s626_s15, %s731_s15   ;;  %s594_s14 = sphi %s624_s14, %s730_s14   ;;  %s590_s13 = sphi %s622_s13, %s729_s13   ;;  %s586_s12 = sphi %s620_s12, %s728_s12  }
   0x4   : > { %s645_s18 = sadd.s32 1, %s598_s15   ;;  %s44_s19 = sadd.s32 1, %s594_s14 }
   0x5   : > { %s41_s20 = ssub.s32 %s598_s15, %s645_s18  ;;  %p51_p0 = scmp.ne.s32.totalorder %s594_s14, %s590_s13 }
   0x6   : > { %p42_p1 = scmp.eq.s32.totalorder %s41_s20, 0  ;;  %p52_p2 = scmp.eq.s32.totalorder %s598_s15, 0 }
   0x7   : > { %p107_p3 = scmp.eq.s32.totalorder %s641_s16, 1  ;;  %p112_p4 = scmp.ne.s32.totalorder %s590_s13, %s586_s12 }
   0x8   : > { %s657_s21 = scalar_select %p42_p1, %s594_s14, %s44_s19  }
   0x9   : > { %p53_p5 = por %p52_p2, %p51_p0  ;;  %p659_p6 = por %p107_p3, %p51_p0 }
   0xa   : > { %p113_p7 = scmp.eq.s32.totalorder %s436_s17, 1  ;;  %p438_p9 = scmp.ge.s32.totalorder %s598_s15, 2 }
   0xc   : > { %p663_p8 = por %p113_p7, %p112_p4  ;;  %132 = sbr.rel (%p438_p9) target bundleno = 29 (0x1d), region = 20 }
  0x11   : > { %135 = sbr.rel (!%p53_p5) target bundleno = 29 (0x1d), region = 24  ;;  %s137_s24 = sand.u32 (%p53_p5), 1, %s594_s14  }
  0x12   : > { %s487_s25 = sshll.u32 (%p53_p5), %s598_s15, 4  ;;  %s439_s26 = sshll.u32 (%p53_p5), %s137_s24, 6 }
  0x13   : > { %s142_s29 = scalar_lea.vmem (%p53_p5), %s723_s1, %s487_s25  ;;  %s139_s30 = scalar_lea.vmem (%p53_p5), [#allocation2], %s439_s26 }
  0x14   : > { %v155_v0 = vld [vmem:[%s142_s29] sm:$0xff] (%p53_p5)  ;;  %v157_v1 = vld [vmem:[%s142_s29 + $0x8] sm:$0xff] (%p53_p5) }
  0x15   : > { %v159_v2 = vld [vmem:[%s142_s29 + $0x20] sm:$0xff] (%p53_p5)  ;;  %156 = vst [vmem:[%s139_s30] sm:$0xff] (%p53_p5), %v155_v0  ;;  %v161_v3 = vld [vmem:[%s142_s29 + $0x28] sm:$0xff] (%p53_p5) }
  0x16   : > { %158 = vst [vmem:[%s139_s30 + $0x8] sm:$0xff] %v157_v1  ;;  %v163_v4 = vld [vmem:[%s142_s29 + $0x40] sm:$0xff]  ;;  %v165_v5 = vld [vmem:[%s142_s29 + $0x48] sm:$0xff] }
  0x17   : > { %160 = vst [vmem:[%s139_s30 + $0x10] sm:$0xff] %v159_v2  ;;  %v167_v6 = vld [vmem:[%s142_s29 + $0x60] sm:$0xff]  ;;  %v169_v7 = vld [vmem:[%s142_s29 + $0x68] sm:$0xff] }
  0x18   : > { %162 = vst [vmem:[%s139_s30 + $0x18] sm:$0xff] %v161_v3 }
  0x19   : > { %164 = vst [vmem:[%s139_s30 + $0x20] sm:$0xff] %v163_v4 }
  0x1a   : > { %166 = vst [vmem:[%s139_s30 + $0x28] sm:$0xff] %v165_v5 }
  0x1b   : > { %168 = vst [vmem:[%s139_s30 + $0x30] sm:$0xff] %v167_v6 }
  0x1c   : > { %170 = vst [vmem:[%s139_s30 + $0x38] sm:$0xff] %v169_v7 }
  0x1d PF: > { %p442_p10 = scmp.ge.s32.totalorder %s598_s15, 1  ;;  %p183_p11 = scmp.lt.s32.totalorder %s598_s15, 3 }
  0x1f   : > { %p184_p12 = pnand %p442_p10, %p183_p11 }
  0x20   : > { %s678_s4 = sand.u32 (!%p184_p12), 1, %s590_s13   ;;  %s445_s9 = sshll.u32 (!%p184_p12), %s641_s16, 2 }
  0x21   : > { %187 = sbr.rel (%p184_p12) target bundleno = 190 (0xbe), region = 51  ;;  %s443_s5 = sshll.u32 (!%p184_p12), %s678_s4, 6 }
  0x22   : > { %s192_s6 = scalar_lea.vmem (!%p184_p12), [#allocation2], %s443_s5  ;;  %p219_p13 = scmp.lt.s32.totalorder (!%p184_p12), %s445_s9, 7 }
  0x23   : > { %s444_s19 = sshll.u32 (!%p184_p12), %s678_s4, 5  ;;  %s496_s20 = sshll.u32 (!%p184_p12), %s641_s16, 5 }
  0x24   : > { %s216_s24 = scalar_lea.vmem (!%p184_p12), [#allocation3], %s444_s19  ;;  %s357_s27 = scalar_lea.hbm (!%p184_p12), %s725_s3, %s496_s20 }
  0x25   : > { %s359_s28 = sshll.u32 (!%p184_p12), %s216_s24, 4  ;;  %s361_s29 = sshll.u32 (!%p184_p12), %s357_s27, 4  ;;  %s360_s28 = int_to_ptr.vmem [resolvable:$true] %s359_s28  ;;  %s362_s29 = int_to_ptr.hbm [resolvable:$true] %s361_s29 }
  0x26   : > { %v464_v8 = vld [vmem:[%s192_s6 + $0x20] sm:$0xf]  ;;  %v494_v9 = vld [vmem:[%s192_s6 + $0x2c] sm:$0xf0]  ;;  %v492_v10 = vld [vmem:[%s192_s6 + $0x24] sm:$0xf] }
  0x27   : > { %v465_v11 = vor.u32 %v494_v9, %v464_v8  ;;  %v466_v12 = vld [vmem:[%s192_s6 + $0x30] sm:$0xf0]  ;;  %v472_v13 = vld [vmem:[%s192_s6 + $0x28] sm:$0xf]  ;;  %v495_v14 = vld [vmem:[%s192_s6 + $0x34] sm:$0xf0] }
  0x28   : > { %v225_v15 = vld [vmem:[%s722_s0] sm:$0xff]  ;;  %v469_v16 = vor.u32 %v492_v10, %v466_v12  ;;  %v473_v17 = vor.u32 %v495_v14, %v472_v13  ;;  %v493_v18 = vld [vmem:[%s192_s6 + $0x2c] sm:$0xf]  ;;  %v474_v19 = vld [vmem:[%s192_s6 + $0x38] sm:$0xf0]  ;;  %vm285_vm0 = vcmask 261120  }
  0x29   : > { %v448_v20 = vld [vmem:[%s192_s6] sm:$0xf]  ;;  %295 = vmatpush.bf16.msra.mxu0 %v465_v11  ;;  %v477_v21 = vor.u32 %v493_v18, %v474_v19  ;;  %v490_v22 = vld [vmem:[%s192_s6 + $0xc] sm:$0xf0]  ;;  %v488_v23 = vld [vmem:[%s192_s6 + $0x4] sm:$0xf]  ;;  %v226_v33 = vpack.c.bf16 %v225_v15, %v225_v15 }
  0x2a   : > { %v450_v24 = vld [vmem:[%s192_s6 + $0x10] sm:$0xf0]  ;;  %308 = vmatpush.bf16.msra.mxu1 %v469_v16  ;;  %321 = vmatpush.bf16.msra.mxu2 %v473_v17  ;;  %v449_v25 = vor.u32 %v490_v22, %v448_v20  ;;  %v456_v27 = vld [vmem:[%s192_s6 + $0x8] sm:$0xf]  ;;  %v491_v28 = vld [vmem:[%s192_s6 + $0x14] sm:$0xf0] }
  0x2b   : > { %v453_v26 = vor.u32 %v488_v23, %v450_v24  ;;  %v489_v29 = vld [vmem:[%s192_s6 + $0xc] sm:$0xf]  ;;  %334 = vmatpush.bf16.msra.mxu3 %v477_v21  ;;  %v457_v30 = vor.u32 %v491_v28, %v456_v27  ;;  %v458_v31 = vld [vmem:[%s192_s6 + $0x18] sm:$0xf0]  ;;  %s733_s9 = smov (!%p219_p13, %s445_s9), 7  ;;  %s346_s16 = scalar_lea.sflag [#allocation4], %s678_s4 }
  0x2c   : > { %v461_v32 = vor.u32 %v489_v29, %v458_v31  ;;  %s221_s17 = scalar_lea.vmem %s724_s2, %s733_s9  ;;  %s550_s30 = sshra.s32 %s362_s29, 4  ;;  %s551_s30 = int_to_ptr.hbm [resolvable:$true] %s550_s30 }
  0x2d   : > { %296 = vmatpush.bf16.msra.mxu0 %v449_v25  ;;  %v235_v34 = vld [vmem:[%s221_s17] sm:$0xf]  ;;  %s552_s5 = scalar_lea.hbm %s551_s30, 32  ;;  %s556_s8 = scalar_lea.hbm %s725_s3, 64 }
  0x2e   : > { %309 = vmatpush.bf16.msra.mxu1 %v453_v26  ;;  %322 = vmatpush.bf16.msra.mxu2 %v457_v30  ;;  %v237_v35 = vperm.slane %v235_v34, 0  ;;  %v238_v36 = vperm.slane %v235_v34, 1  ;;  %v239_v41 = vperm.slane %v235_v34, 2  ;;  %v240_v42 = vperm.slane %v235_v34, 3  ;;  %p553_p0 = scmp.ne.s32.totalorder %s551_s30, %s552_s5  ;;  %p557_p3 = scmp.lt.s32.totalorder %s551_s30, %s725_s3 }
  0x2f   : > { %335 = vmatpush.bf16.msra.mxu3 %v461_v32  ;;  %p558_p4 = scmp.lt.s32.totalorder %s556_s8, %s552_s5 }
  0x30   : > { %478 = vmatmul.msk.bf16.vlgmr.msra.gmra.mxu0 %vm285_vm0, %v226_v33  ;;  %p554_p1 = pnand %p553_p0, %p659_p6 }
  0x31   : > { %479 = vmatmul.msk.bf16.vlgmr.msra.gmra.mxu1 %vm285_vm0, %v226_v33  ;;  %480 = vmatmul.msk.bf16.vlgmr.msra.gmra.mxu2 %vm285_vm0, %v226_v33  ;;  %p559_p5 = por %p558_p4, %p557_p3 }
  0x32   : > { %481 = vmatmul.msk.bf16.vlgmr.msra.gmra.mxu3 %vm285_vm0, %v226_v33  ;;  %p555_p2 = pneg %p554_p1 }
  0x34   : > { %p560_p7 = pnand %p559_p5, %p555_p2 }
  0xad   : > { %v298_v37 = vpop.f32.mrf.mxu0 }
  0xae   : > { %v299_v38 = vadd.f32 %v298_v37, %v237_v35  ;;  %v311_v39 = vpop.f32.mrf.mxu1 }
  0xaf   : > { %v312_v40 = vadd.f32 %v311_v39, %v238_v36 }
  0xb0   : > { %341 = vst [vmem:[%s216_s24] sm:$0xff] %v299_v38 }
  0xb1   : > { %342 = vst [vmem:[%s216_s24 + $0x8] sm:$0xff] %v312_v40 }
  0xb4   : > { %v324_v43 = vpop.f32.mrf.mxu2 }
  0xb5   : > { %v325_v44 = vadd.f32 %v324_v43, %v239_v41  ;;  %v337_v45 = vpop.f32.mrf.mxu3  ;;  %v300_v46 = vpop.f32.mrf.mxu0 }
  0xb6   : > { %v338_v47 = vadd.f32 %v337_v45, %v240_v42  ;;  %v313_v48 = vpop.f32.mrf.mxu1 }
  0xb7   : > { %343 = vst [vmem:[%s216_s24 + $0x10] sm:$0xff] %v325_v44 }
  0xb8   : > { %344 = vst [vmem:[%s216_s24 + $0x18] sm:$0xff] %v338_v47 }
  0xb9   : > { %563 = shalt.err (!%p560_p7)
}
  0xba   : > { %497 = dma.vmem_to_hbm [thread:$0]  (%p659_p6), %s360_s28, 512, %s362_s29, %s346_s16  }
  0xbc   : > { %v326_v49 = vpop.f32.mrf.mxu2 }
  0xbd   : > { %v339_v50 = vpop.f32.mrf.mxu3 }
  0xbe PF: > { %s373_s4 = sand.u32 1, %s586_s12   ;;  %p500_p10 = pnand %p438_p9, %p663_p8 }
  0xbf   : > { %s374_s11 = scalar_lea.sflag [#allocation4], %s373_s4 }
  0xc0   : > { %p501_p11 = pneg %p500_p10 }
  0xc2   : > { %581 = dma.done.wait (%p501_p11), %s374_s11, 512  }
  0xc3   : > { %583 = vsyncadd (%p501_p11), %s374_s11, 4294966784  ;;  %p13_p6 = scmp.ge.s32.totalorder %s645_s18, 4   ;;  %s728_s12 = smov %s590_s13 }
  0xc4   : > { %s729_s13 = smov %s594_s14  ;;  %s730_s14 = smov %s657_s21 }
  0xc5   : > { %s731_s15 = smov %s645_s18  ;;  %15 = sbr.rel (!%p13_p6) target bundleno = 3 (0x3), region = 98 }
  0xca   :  { %380 = vsyncpa [#allocation4], 1 }
  0xcb   :  { %382 = vsyncpa [#allocation4 + $0x1], 1 }

</bundles_post_ra>
